<compile_context>
chip_gen: v7x
topology: tpu7x:2x2x1
jax: 0.10.0
libtpu: 0.0.40
codegen_flags: <defaults>
</compile_context>

<pallas_src>
import jax
import jax.numpy as jnp
from jax.experimental import pallas as pl
from jax.experimental.pallas import tpu as pltpu


def _round_up(x, m):
    return ((x + m - 1) // m) * m


def stack_attention_kernel(xi_ref, xq_ref,
                           wi_ref, wq_ref, bsum_ref,
                           wa_ref, ba_ref,
                           o_ref):
    # Two input projections accumulate into a single f32 accumulator (MXU,
    # bf16 operands, f32 accumulation).
    acc = jnp.dot(xi_ref[...], wi_ref[...], preferred_element_type=jnp.float32)
    acc = acc + jnp.dot(xq_ref[...], wq_ref[...],
                        preferred_element_type=jnp.float32)
    # Fused bias + tanh in f32 (VPU/EUP). Dropout is identity in eval mode.
    h_attn = jnp.tanh(acc + bsum_ref[...])
    # Output projection: cast the activation back to the MXU dtype, keep f32
    # accumulation, add the output bias in f32.
    out = jnp.dot(h_attn.astype(wa_ref.dtype), wa_ref[...],
                  preferred_element_type=jnp.float32) + ba_ref[...]
    o_ref[...] = out.astype(o_ref.dtype)


def stack_attention(image_embed, ques_embed, params, *,
                    tile_m=256, compute_dtype=jnp.bfloat16):
    """image_embed, ques_embed: (B, S, d_model) with identical shapes."""
    W_img, b_img, W_q, b_q, W_att, b_att = params
    B, S, d_model = image_embed.shape
    ff_dim = W_img.shape[1]
    out_dtype = image_embed.dtype

    # Lane-dense feature dims (multiples of 128). Zero padding preserves
    # semantics: padded hidden cols are tanh(0 + 0) = 0 and multiply zero
    # rows of the (padded) output weight; padded output cols are sliced off.
    dp = _round_up(d_model, 128)
    fp = _round_up(ff_dim, 128)

    N = B * S
    xi = image_embed.reshape(N, d_model)
    xq = ques_embed.reshape(N, d_model)

    # Row tile: multiple of 8 sublanes, clamped for small inputs, rows padded
    # up to a tile multiple.
    tile = min(tile_m, _round_up(N, 8))
    tile = max(8, (tile // 8) * 8)
    Np = _round_up(N, tile)
    grid = (Np // tile,)

    def pad2(x, rows, cols):
        return jnp.pad(x, ((0, rows - x.shape[0]), (0, cols - x.shape[1])))

    comp = jnp.dtype(compute_dtype)
    xi_p = pad2(xi, Np, dp).astype(comp)
    xq_p = pad2(xq, Np, dp).astype(comp)
    Wi_p = pad2(W_img, dp, fp).astype(comp)
    Wq_p = pad2(W_q, dp, fp).astype(comp)
    Wa_p = pad2(W_att, fp, dp).astype(comp)
    # Fused input bias (b_img + b_q), kept in f32 and added post-accumulation.
    b_sum = jnp.pad((b_img + b_q).astype(jnp.float32),
                    (0, fp - ff_dim)).reshape(1, fp)
    b_out = jnp.pad(b_att.astype(jnp.float32),
                    (0, dp - d_model)).reshape(1, dp)

    row_spec = pl.BlockSpec((tile, dp), lambda i: (i, 0))
    # Grid-invariant weights/biases: whole array resident in VMEM, no
    # per-step re-blocking or double-buffer reservation.
    resident = pl.BlockSpec(memory_space=pltpu.MemorySpace.VMEM)

    out_bytes = jnp.dtype(out_dtype).itemsize
    cost = pl.CostEstimate(
        flops=6 * Np * dp * fp,                       # 3 matmuls (2*M*K*N each)
        transcendentals=Np * fp,                      # tanh
        bytes_accessed=(2 * Np * dp * comp.itemsize   # xi, xq
                        + Np * dp * out_bytes         # output
                        + 3 * dp * fp * comp.itemsize # weights
                        + (fp + dp) * 4),             # biases
    )

    out = pl.pallas_call(
        stack_attention_kernel,
        out_shape=jax.ShapeDtypeStruct((Np, dp), out_dtype),
        grid_spec=pltpu.PrefetchScalarGridSpec(
            num_scalar_prefetch=0,
            grid=grid,
            in_specs=[row_spec, row_spec,
                      resident, resident, resident,   # W_img, W_q, b_sum
                      resident, resident],            # W_att, b_att
            out_specs=pl.BlockSpec((tile, dp), lambda i: (i, 0)),
        ),
        compiler_params=pltpu.CompilerParams(
            dimension_semantics=("parallel",)),
        cost_estimate=cost,
    )(xi_p, xq_p, Wi_p, Wq_p, b_sum, Wa_p, b_out)

    return out[:N, :d_model].reshape(B, S, d_model)


def init_params(key, d_model, ff_dim, dtype=jnp.float32):
    """Deterministic torch.nn.Linear-style init (uniform +/- 1/sqrt(fan_in)).

    Weights are stored as (in_features, out_features)."""
    ks = jax.random.split(key, 6)
    lim_in = 1.0 / jnp.sqrt(d_model)
    lim_ff = 1.0 / jnp.sqrt(ff_dim)
    W_img = jax.random.uniform(ks[0], (d_model, ff_dim), dtype, -lim_in, lim_in)
    b_img = jax.random.uniform(ks[1], (ff_dim,), dtype, -lim_in, lim_in)
    W_q = jax.random.uniform(ks[2], (d_model, ff_dim), dtype, -lim_in, lim_in)
    b_q = jax.random.uniform(ks[3], (ff_dim,), dtype, -lim_in, lim_in)
    W_att = jax.random.uniform(ks[4], (ff_dim, d_model), dtype, -lim_ff, lim_ff)
    b_att = jax.random.uniform(ks[5], (d_model,), dtype, -lim_ff, lim_ff)
    return (W_img, b_img, W_q, b_q, W_att, b_att)


def stack_attention_ref(image_embed, ques_embed, params):
    W_img, b_img, W_q, b_q, W_att, b_att = params
    h_img = image_embed @ W_img + b_img
    h_qus = ques_embed @ W_q + b_q
    h = jnp.tanh(h_img + h_qus)
    return h @ W_att + b_att


if __name__ == "__main__":
    # Small, d_model / ff_dim scaled down from (768, 512).
    B, S, d_model, ff_dim = 2, 8, 32, 64

    key = jax.random.PRNGKey(0)
    k_img, k_q, k_p = jax.random.split(key, 3)

    image_embed = jax.random.normal(k_img, (B, S, d_model), jnp.float32)
    ques_embed = jax.random.normal(k_q, (B, S, d_model), jnp.float32)
    params = init_params(k_p, d_model, ff_dim)

    out = stack_attention(image_embed, ques_embed, params)
    out = jax.block_until_ready(out)

    ref = stack_attention_ref(image_embed, ques_embed, params)
    assert out.shape == (B, S, d_model)
    assert jnp.all(jnp.isfinite(out))
    # bf16 MXU operands (f32 accumulation) -> compare against the f32
    # reference with a bf16-appropriate tolerance.
    assert jnp.allclose(out, ref, atol=3e-2, rtol=3e-2)

    print("KERNEL_OK")
</pallas_src>

<mosaic_0001>
module attributes {stable_mosaic.version = 11 : i64} {
  func.func @stack_attention_kernel(%arg0: i32, %arg1: memref<16x128xbf16, #tpu.memory_space<vmem>>, %arg2: memref<16x128xbf16, #tpu.memory_space<vmem>>, %arg3: memref<128x128xbf16, #tpu.memory_space<vmem>>, %arg4: memref<128x128xbf16, #tpu.memory_space<vmem>>, %arg5: memref<1x128xf32, #tpu.memory_space<vmem>>, %arg6: memref<128x128xbf16, #tpu.memory_space<vmem>>, %arg7: memref<1x128xf32, #tpu.memory_space<vmem>>, %arg8: memref<16x128xf32, #tpu.memory_space<vmem>>) attributes {dimension_semantics = [#tpu.dimension_semantics<parallel>], iteration_bounds = array<i64: 1>, scalar_prefetch = 0 : i64, scratch_operands = 0 : i64, tpu.core_type = #tpu.core_type<tc>, window_params = [{transform_indices = @transform_0, window_bounds = array<i64: 16, 128>}, {transform_indices = @transform_1, window_bounds = array<i64: 16, 128>}, {pipeline_mode = #tpu.pipeline_mode<synchronous>, transform_indices = @transform_2, window_bounds = array<i64: 128, 128>}, {pipeline_mode = #tpu.pipeline_mode<synchronous>, transform_indices = @transform_3, window_bounds = array<i64: 128, 128>}, {pipeline_mode = #tpu.pipeline_mode<synchronous>, transform_indices = @transform_4, window_bounds = array<i64: 1, 128>}, {pipeline_mode = #tpu.pipeline_mode<synchronous>, transform_indices = @transform_5, window_bounds = array<i64: 128, 128>}, {pipeline_mode = #tpu.pipeline_mode<synchronous>, transform_indices = @transform_6, window_bounds = array<i64: 1, 128>}, {transform_indices = @transform_7, window_bounds = array<i64: 16, 128>}]} {
    %c0 = arith.constant 0 : index
    %c0_0 = arith.constant 0 : index
    %0 = vector.load %arg1[%c0, %c0_0] : memref<16x128xbf16, #tpu.memory_space<vmem>>, vector<16x128xbf16>
    %c0_1 = arith.constant 0 : index
    %c0_2 = arith.constant 0 : index
    %1 = vector.load %arg3[%c0_1, %c0_2] : memref<128x128xbf16, #tpu.memory_space<vmem>>, vector<128x128xbf16>
    %cst = arith.constant dense<0.000000e+00> : vector<16x128xf32>
    %2 = tpu.matmul %0, %1, %cst {dimension_numbers = #tpu.dot_dimension_numbers<[1], [0], [0], [1], [0, 0, 1, 1], [], []>} : vector<16x128xbf16>, vector<128x128xbf16>, vector<16x128xf32> -> vector<16x128xf32>
    %c0_3 = arith.constant 0 : index
    %c0_4 = arith.constant 0 : index
    %3 = vector.load %arg2[%c0_3, %c0_4] : memref<16x128xbf16, #tpu.memory_space<vmem>>, vector<16x128xbf16>
    %c0_5 = arith.constant 0 : index
    %c0_6 = arith.constant 0 : index
    %4 = vector.load %arg4[%c0_5, %c0_6] : memref<128x128xbf16, #tpu.memory_space<vmem>>, vector<128x128xbf16>
    %cst_7 = arith.constant dense<0.000000e+00> : vector<16x128xf32>
    %5 = tpu.matmul %3, %4, %cst_7 {dimension_numbers = #tpu.dot_dimension_numbers<[1], [0], [0], [1], [0, 0, 1, 1], [], []>} : vector<16x128xbf16>, vector<128x128xbf16>, vector<16x128xf32> -> vector<16x128xf32>
    %6 = arith.addf %2, %5 : vector<16x128xf32>
    %c0_8 = arith.constant 0 : index
    %c0_9 = arith.constant 0 : index
    %7 = vector.load %arg5[%c0_8, %c0_9] : memref<1x128xf32, #tpu.memory_space<vmem>>, vector<1x128xf32>
    %8 = vector.broadcast %7 : vector<1x128xf32> to vector<16x128xf32>
    %9 = arith.addf %6, %8 : vector<16x128xf32>
    %10 = math.tanh %9 : vector<16x128xf32>
    %11 = arith.truncf %10 : vector<16x128xf32> to vector<16x128xbf16>
    %c0_10 = arith.constant 0 : index
    %c0_11 = arith.constant 0 : index
    %12 = vector.load %arg6[%c0_10, %c0_11] : memref<128x128xbf16, #tpu.memory_space<vmem>>, vector<128x128xbf16>
    %cst_12 = arith.constant dense<0.000000e+00> : vector<16x128xf32>
    %13 = tpu.matmul %11, %12, %cst_12 {dimension_numbers = #tpu.dot_dimension_numbers<[1], [0], [0], [1], [0, 0, 1, 1], [], []>} : vector<16x128xbf16>, vector<128x128xbf16>, vector<16x128xf32> -> vector<16x128xf32>
    %c0_13 = arith.constant 0 : index
    %c0_14 = arith.constant 0 : index
    %14 = vector.load %arg7[%c0_13, %c0_14] : memref<1x128xf32, #tpu.memory_space<vmem>>, vector<1x128xf32>
    %15 = vector.broadcast %14 : vector<1x128xf32> to vector<16x128xf32>
    %16 = arith.addf %13, %15 : vector<16x128xf32>
    %c0_15 = arith.constant 0 : index
    %c0_16 = arith.constant 0 : index
    %17 = vector.load %arg8[%c0_15, %c0_16] : memref<16x128xf32, #tpu.memory_space<vmem>>, vector<16x128xf32>
    tpu.vector_store %arg8[%c0_15, %c0_16], %16 {strides = array<i32>} : memref<16x128xf32, #tpu.memory_space<vmem>>, vector<16x128xf32>,
    return
  }
  func.func @transform_0(%arg0: i32) -> (i32, i32) {
    %c0_i32 = arith.constant 0 : i32
    %c0_i32_0 = arith.constant 0 : i32
    return %arg0, %c0_i32 : i32, i32
  }
  func.func @transform_1(%arg0: i32) -> (i32, i32) {
    %c0_i32 = arith.constant 0 : i32
    %c0_i32_0 = arith.constant 0 : i32
    return %arg0, %c0_i32 : i32, i32
  }
  func.func @transform_2(%arg0: i32) -> (i32, i32) {
    %c0_i32 = arith.constant 0 : i32
    %c0_i32_0 = arith.constant 0 : i32
    %c0_i32_1 = arith.constant 0 : i32
    return %c0_i32, %c0_i32_0 : i32, i32
  }
  func.func @transform_3(%arg0: i32) -> (i32, i32) {
    %c0_i32 = arith.constant 0 : i32
    %c0_i32_0 = arith.constant 0 : i32
    %c0_i32_1 = arith.constant 0 : i32
    return %c0_i32, %c0_i32_0 : i32, i32
  }
  func.func @transform_4(%arg0: i32) -> (i32, i32) {
    %c0_i32 = arith.constant 0 : i32
    %c0_i32_0 = arith.constant 0 : i32
    %c0_i32_1 = arith.constant 0 : i32
    return %c0_i32, %c0_i32_0 : i32, i32
  }
  func.func @transform_5(%arg0: i32) -> (i32, i32) {
    %c0_i32 = arith.constant 0 : i32
    %c0_i32_0 = arith.constant 0 : i32
    %c0_i32_1 = arith.constant 0 : i32
    return %c0_i32, %c0_i32_0 : i32, i32
  }
  func.func @transform_6(%arg0: i32) -> (i32, i32) {
    %c0_i32 = arith.constant 0 : i32
    %c0_i32_0 = arith.constant 0 : i32
    %c0_i32_1 = arith.constant 0 : i32
    return %c0_i32, %c0_i32_0 : i32, i32
  }
  func.func @transform_7(%arg0: i32) -> (i32, i32) {
    %c0_i32 = arith.constant 0 : i32
    %c0_i32_0 = arith.constant 0 : i32
    return %arg0, %c0_i32 : i32, i32
  }
}

</mosaic_0001>

<bundles_post_ra>
// kernel: tpu_custom_call.1
= control target key start
LH: loop header
LB: loop body
LE: loop exit
PB: predicated region body
PF: predicated region fallthrough
CT: control target
= control target key end

     0   :  { %12 = vsyncpa [#allocation3], 0  ;;  %s953_s0 = inlined_call_operand.hbm [shape: bf16[16,128], index: 0, kind: input, shape index: {}]   ;;  %s954_s1 = inlined_call_operand.hbm [shape: bf16[16,128], index: 1, kind: input, shape index: {}]   ;;  %s955_s2 = inlined_call_operand.hbm [shape: bf16[128,128], index: 2, kind: input, shape index: {}]   ;;  %s956_s3 = inlined_call_operand.hbm [shape: bf16[128,128], index: 3, kind: input, shape index: {}]   ;;  %s957_s4 = inlined_call_operand.vmem [shape: f32[1,128], index: 4, kind: input, shape index: {}]   ;;  %s958_s5 = inlined_call_operand.hbm [shape: bf16[128,128], index: 5, kind: input, shape index: {}]   ;;  %s959_s6 = inlined_call_operand.vmem [shape: f32[1,128], index: 6, kind: input, shape index: {}]   ;;  %s960_s7 = inlined_call_operand.hbm [shape: f32[16,128], index: 7, kind: output, shape index: {}]  }
   0x1   :  { %13 = vsyncpa [#allocation6], 0 }
   0x2   :  { %14 = vsyncpa [#allocation9], 0 }
   0x3   :  { %15 = vsyncpa [#allocation4], 0  ;;  %s764_s24 = smov [#allocation5]   ;;  %s765_s26 = smov [#allocation8]  }
   0x4   :  { %s33_s25 = sshll.u32 %s764_s24, 4  ;;  %s57_s27 = sshll.u32 %s765_s26, 4  ;;  %s34_s25 = int_to_ptr.vmem [resolvable:$true] %s33_s25  ;;  %s816_s27 = int_to_ptr.vmem [resolvable:$true] %s57_s27 }
   0x5   :  { %s624_s30 = scalar_lea.hbm %s954_s1, 128 }
   0x6   :  { %p625_p0 = scmp.ne.s32.totalorder %s954_s1, %s624_s30  ;;  %p628_p1 = scmp.lt.u32.totalorder %s624_s30, %s954_s1 }
   0x8   :  { %p630_p2 = pnand %p628_p1, %p625_p0 }
   0xa   :  { %633 = shalt.err (!%p630_p2)
}
   0xb   :  { %s634_s12 = scalar_lea.vmem %s34_s25, 128  ;;  %p639_p4 = scmp.lt.s32.totalorder %s34_s25, %s34_s25 }
   0xc   :  { %p635_p3 = scmp.ne.s32.totalorder %s34_s25, %s634_s12  ;;  %p640_p5 = scmp.lt.s32.totalorder %s634_s12, %s634_s12 }
   0xe   :  { %p641_p6 = por %p640_p5, %p639_p4 }
  0x10   :  { %p642_p7 = pnand %p641_p6, %p635_p3 }
  0x12   :  { %645 = shalt.err (!%p642_p7)
}
  0x13   :  { %s766_s13 = smov 64   ;;  %s767_s14 = smov 4  }
  0x14   :  { %39 = dma.hbm_to_vmem [thread:$0]  %s954_s1, 128, %s34_s25, [#allocation6], %s766_s13, %s766_s13, %s767_s14  }
  0x15   :  { %s646_s19 = scalar_lea.hbm %s956_s3, 1024 }
  0x16   :  { %p647_p8 = scmp.ne.s32.totalorder %s956_s3, %s646_s19  ;;  %p650_p9 = scmp.lt.u32.totalorder %s646_s19, %s956_s3 }
  0x18   :  { %p652_p10 = pnand %p650_p9, %p647_p8 }
  0x1a   :  { %655 = shalt.err (!%p652_p10)
}
  0x1b   :  { %s656_s24 = scalar_lea.vmem %s816_s27, 1024  ;;  %p661_p12 = scmp.lt.s32.totalorder %s816_s27, %s816_s27 }
  0x1c   :  { %p657_p11 = scmp.ne.s32.totalorder %s816_s27, %s656_s24  ;;  %p662_p13 = scmp.lt.s32.totalorder %s656_s24, %s656_s24 }
  0x1e   :  { %p663_p0 = por %p662_p13, %p661_p12 }
  0x20   :  { %p664_p1 = pnand %p663_p0, %p657_p11 }
  0x22   :  { %667 = shalt.err (!%p664_p1)
}
  0x23   :  { %63 = dma.hbm_to_vmem [thread:$0]  %s956_s3, 1024, %s816_s27, [#allocation9], %s766_s13, %s766_s13, %s767_s14  }
  0x24   :  { %s768_s26 = smov [#allocation2]   ;;  %s769_s29 = smov [#allocation7]  }
  0x25   :  { %s21_s28 = sshll.u32 %s768_s26, 4  ;;  %s45_s30 = sshll.u32 %s769_s29, 4  ;;  %s22_s28 = int_to_ptr.vmem [resolvable:$true] %s21_s28  ;;  %s853_s30 = int_to_ptr.vmem [resolvable:$true] %s45_s30 }
  0x26   :  { %s668_s10 = scalar_lea.hbm %s953_s0, 128 }
  0x27   :  { %p669_p2 = scmp.ne.s32.totalorder %s953_s0, %s668_s10  ;;  %p672_p3 = scmp.lt.u32.totalorder %s668_s10, %s953_s0 }
  0x29   :  { %p674_p4 = pnand %p672_p3, %p669_p2 }
  0x2b   :  { %677 = shalt.err (!%p674_p4)
}
  0x2c   :  { %s678_s3 = scalar_lea.vmem %s22_s28, 128  ;;  %p683_p6 = scmp.lt.s32.totalorder %s22_s28, %s22_s28 }
  0x2d   :  { %p679_p5 = scmp.ne.s32.totalorder %s22_s28, %s678_s3  ;;  %p684_p7 = scmp.lt.s32.totalorder %s678_s3, %s678_s3 }
  0x2f   :  { %p685_p8 = por %p684_p7, %p683_p6 }
  0x31   :  { %p686_p9 = pnand %p685_p8, %p679_p5 }
  0x33   :  { %689 = shalt.err (!%p686_p9)
}
  0x34   :  { %27 = dma.hbm_to_vmem [thread:$0]  %s953_s0, 128, %s22_s28, [#allocation3], %s766_s13, %s766_s13, %s767_s14  }
  0x35   :  { %s690_s20 = scalar_lea.hbm %s955_s2, 1024 }
  0x36   :  { %p691_p10 = scmp.ne.s32.totalorder %s955_s2, %s690_s20  ;;  %p694_p11 = scmp.lt.u32.totalorder %s690_s20, %s955_s2 }
  0x38   :  { %p696_p12 = pnand %p694_p11, %p691_p10 }
  0x3a   :  { %699 = shalt.err (!%p696_p12)
}
  0x3b   :  { %s700_s1 = scalar_lea.vmem %s853_s30, 1024  ;;  %p705_p0 = scmp.lt.s32.totalorder %s853_s30, %s853_s30 }
  0x3c   :  { %p701_p13 = scmp.ne.s32.totalorder %s853_s30, %s700_s1  ;;  %p706_p1 = scmp.lt.s32.totalorder %s700_s1, %s700_s1 }
  0x3e   :  { %p707_p2 = por %p706_p1, %p705_p0 }
  0x40   :  { %p708_p3 = pnand %p707_p2, %p701_p13 }
  0x42   :  { %711 = shalt.err (!%p708_p3)
}
  0x43   :  { %51 = dma.hbm_to_vmem [thread:$0]  %s955_s2, 1024, %s853_s30, [#allocation6], %s766_s13, %s766_s13, %s767_s14  }
  0x44   :  { %s770_s26 = smov [#allocation10]   ;;  %s712_s9 = scalar_lea.hbm %s958_s5, 1024 }
  0x45   :  { %s71_s28 = sshll.u32 %s770_s26, 4  ;;  %p713_p4 = scmp.ne.s32.totalorder %s958_s5, %s712_s9  ;;  %s72_s28 = int_to_ptr.vmem [resolvable:$true] %s71_s28 }
  0x46   :  { %p716_p5 = scmp.lt.u32.totalorder %s712_s9, %s958_s5 }
  0x48   :  { %p718_p6 = pnand %p716_p5, %p713_p4 }
  0x4a   :  { %721 = shalt.err (!%p718_p6)
}
  0x4b   :  { %s722_s16 = scalar_lea.vmem %s72_s28, 1024  ;;  %p727_p8 = scmp.lt.s32.totalorder %s72_s28, %s72_s28 }
  0x4c   :  { %p723_p7 = scmp.ne.s32.totalorder %s72_s28, %s722_s16  ;;  %p728_p9 = scmp.lt.s32.totalorder %s722_s16, %s722_s16 }
  0x4e   :  { %p729_p10 = por %p728_p9, %p727_p8 }
  0x50   :  { %p730_p11 = pnand %p729_p10, %p723_p7 }
  0x52   :  { %733 = shalt.err (!%p730_p11)
}
  0x53   :  { %77 = dma.hbm_to_vmem [thread:$0]  %s958_s5, 1024, %s72_s28, [#allocation9], %s766_s13, %s766_s13, %s767_s14  }
  0x54   :  { %756 = dma.done.wait [#allocation3], 128  }
  0x55   :  { %757 = vsyncadd [#allocation3], 4294967168 }
  0x56   :  { %758 = dma.done.wait [#allocation6], 1152  }
  0x57   :  { %759 = vsyncadd [#allocation6], 4294966144 }
  0x58   :  { %760 = dma.done.wait [#allocation9], 2048  }
  0x59   :  { %761 = vsyncadd [#allocation9], 4294965248  ;;  %v771_v0 = vmov 0.0   ;;  %vm772_vm0 = vmmov 0   ;;  %v594_v1 = vld [vmem:[#allocation8] sm:$0xff]   ;;  %v596_v3 = vld [vmem:[#allocation8 + $0x8] sm:$0xff]  }
  0x5a   :  { %522 = vmatprep.subr.bf16.mxu0 %v771_v0  ;;  %542 = vmatprep.subr.bf16.mxu1 %v771_v0  ;;  %v595_v2 = vld [vmem:[#allocation7] sm:$0xff]   ;;  %v597_v4 = vld [vmem:[#allocation7 + $0x8] sm:$0xff]   ;;  %v598_v5 = vld [vmem:[#allocation8 + $0x10] sm:$0xff]  }
  0x5b   :  { %538 = vmatprep.mubr.msk.bf16.mxu0 %vm772_vm0, %v771_v0  ;;  %558 = vmatprep.mubr.msk.bf16.mxu1 %vm772_vm0, %v771_v0  ;;  %v599_v6 = vld [vmem:[#allocation7 + $0x10] sm:$0xff]   ;;  %v600_v7 = vld [vmem:[#allocation8 + $0x18] sm:$0xff]   ;;  %v602_v9 = vld [vmem:[#allocation8 + $0x20] sm:$0xff]  }
  0x5c   :  { %523 = vmatpush3.bf16.msra.mxu0 %v594_v1  ;;  %543 = vmatpush3.bf16.msra.mxu1 %v595_v2  ;;  %v601_v8 = vld [vmem:[#allocation7 + $0x18] sm:$0xff]   ;;  %v603_v10 = vld [vmem:[#allocation7 + $0x20] sm:$0xff]   ;;  %v604_v11 = vld [vmem:[#allocation8 + $0x28] sm:$0xff]  }
  0x5d   :  { %524 = vmatprep.subr.bf16.mxu0 %v771_v0  ;;  %544 = vmatprep.subr.bf16.mxu1 %v771_v0  ;;  %v605_v12 = vld [vmem:[#allocation7 + $0x28] sm:$0xff]   ;;  %v606_v13 = vld [vmem:[#allocation8 + $0x30] sm:$0xff]   ;;  %v608_v15 = vld [vmem:[#allocation8 + $0x38] sm:$0xff]  }
  0x5e   :  { %v607_v14 = vld [vmem:[#allocation7 + $0x30] sm:$0xff]   ;;  %v609_v16 = vld [vmem:[#allocation7 + $0x38] sm:$0xff]   ;;  %v612_v19 = vld [vmem:[#allocation10] sm:$0xff]  }
  0x5f   :  { %v610_v17 = vld [vmem:[#allocation5] sm:$0xff]   ;;  %v611_v18 = vld [vmem:[#allocation2] sm:$0xff]   ;;  %v613_v20 = vld [vmem:[#allocation10 + $0x8] sm:$0xff]  }
  0x60   :  { %525 = vmatpush3.bf16.msra.mxu0 %v596_v3  ;;  %545 = vmatpush3.bf16.msra.mxu1 %v597_v4  ;;  %v614_v21 = vld [vmem:[#allocation10 + $0x10] sm:$0xff]   ;;  %v615_v22 = vld [vmem:[#allocation10 + $0x18] sm:$0xff]   ;;  %v616_v23 = vld [vmem:[#allocation10 + $0x20] sm:$0xff]  }
  0x61   :  { %526 = vmatprep.subr.bf16.mxu0 %v771_v0  ;;  %546 = vmatprep.subr.bf16.mxu1 %v771_v0  ;;  %v617_v24 = vld [vmem:[#allocation10 + $0x28] sm:$0xff]   ;;  %v618_v25 = vld [vmem:[#allocation10 + $0x30] sm:$0xff]   ;;  %v619_v26 = vld [vmem:[#allocation10 + $0x38] sm:$0xff]  }
  0x62   :  { %v485_v29 = vld [vmem:[%s957_s4] ss:$0 sm:$0xff]  ;;  %s773_s4 = smov [#allocation11]  }
  0x63   :  { %v486_v43 = vld [vmem:[%s959_s6] ss:$0 sm:$0xff]  ;;  %s453_s27 = sshll.u32 %s773_s4, 4  ;;  %s454_s27 = int_to_ptr.vmem [resolvable:$true] %s453_s27 }
  0x64   :  { %527 = vmatpush3.bf16.msra.mxu0 %v598_v5  ;;  %547 = vmatpush3.bf16.msra.mxu1 %v599_v6  ;;  %s734_s17 = scalar_lea.vmem %s454_s27, 256  ;;  %p739_p13 = scmp.lt.s32.totalorder %s454_s27, %s454_s27 }
  0x65   :  { %528 = vmatprep.subr.bf16.mxu0 %v771_v0  ;;  %548 = vmatprep.subr.bf16.mxu1 %v771_v0  ;;  %p735_p12 = scmp.ne.s32.totalorder %s454_s27, %s734_s17  ;;  %p740_p0 = scmp.lt.s32.totalorder %s734_s17, %s734_s17 }
  0x67   :  { %p741_p1 = por %p740_p0, %p739_p13 }
  0x68   :  { %529 = vmatpush3.bf16.msra.mxu0 %v600_v7  ;;  %549 = vmatpush3.bf16.msra.mxu1 %v601_v8 }
  0x69   :  { %530 = vmatprep.subr.bf16.mxu0 %v771_v0  ;;  %550 = vmatprep.subr.bf16.mxu1 %v771_v0  ;;  %p742_p2 = pnand %p741_p1, %p735_p12 }
  0x6c   :  { %531 = vmatpush3.bf16.msra.mxu0 %v602_v9  ;;  %551 = vmatpush3.bf16.msra.mxu1 %v603_v10 }
  0x6d   :  { %532 = vmatprep.subr.bf16.mxu0 %v771_v0  ;;  %552 = vmatprep.subr.bf16.mxu1 %v771_v0 }
  0x70   :  { %533 = vmatpush3.bf16.msra.mxu0 %v604_v11  ;;  %553 = vmatpush3.bf16.msra.mxu1 %v605_v12 }
  0x71   :  { %534 = vmatprep.subr.bf16.mxu0 %v771_v0  ;;  %554 = vmatprep.subr.bf16.mxu1 %v771_v0 }
  0x74   :  { %535 = vmatpush3.bf16.msra.mxu0 %v606_v13  ;;  %555 = vmatpush3.bf16.msra.mxu1 %v607_v14 }
  0x75   :  { %536 = vmatprep.subr.bf16.mxu0 %v771_v0  ;;  %556 = vmatprep.subr.bf16.mxu1 %v771_v0 }
  0x78   :  { %537 = vmatpush3.bf16.msra.mxu0 %v608_v15  ;;  %557 = vmatpush3.bf16.msra.mxu1 %v609_v16 }
  0x79   :  { %562 = vmatprep.subr.bf16.mxu0 %v771_v0 }
  0x7b   :  { %539 = vmatmul.mubr.bf16.vlgmr.msra.gmra.mrb[0].mxu0 %v610_v17  ;;  %559 = vmatmul.mubr.bf16.vlgmr.msra.gmra.mrb[0].mxu1 %v611_v18 }
  0x7c   :  { %563 = vmatpush3.bf16.msra.mxu0 %v612_v19  ;;  %578 = vmatprep.mubr.msk.bf16.mxu0 %vm772_vm0, %v771_v0 }
  0x7d   :  { %564 = vmatprep.subr.bf16.mxu0 %v771_v0 }
  0x80   :  { %565 = vmatpush3.bf16.msra.mxu0 %v613_v20 }
  0x81   :  { %566 = vmatprep.subr.bf16.mxu0 %v771_v0 }
  0x84   :  { %567 = vmatpush3.bf16.msra.mxu0 %v614_v21 }
  0x85   :  { %568 = vmatprep.subr.bf16.mxu0 %v771_v0 }
  0x88   :  { %569 = vmatpush3.bf16.msra.mxu0 %v615_v22 }
  0x89   :  { %570 = vmatprep.subr.bf16.mxu0 %v771_v0 }
  0x8c   :  { %571 = vmatpush3.bf16.msra.mxu0 %v616_v23 }
  0x8d   :  { %572 = vmatprep.subr.bf16.mxu0 %v771_v0 }
  0x90   :  { %573 = vmatpush3.bf16.msra.mxu0 %v617_v24 }
  0x91   :  { %574 = vmatprep.subr.bf16.mxu0 %v771_v0 }
  0x94   :  { %575 = vmatpush3.bf16.msra.mxu0 %v618_v25 }
  0x95   :  { %576 = vmatprep.subr.bf16.mxu0 %v771_v0 }
  0x98   :  { %577 = vmatpush3.bf16.msra.mxu0 %v619_v26 }
 0x14e   :  { %v220_v27 = vpop.f32.mrb[0].mxu0  ;;  %v315_v28 = vpop.f32.mrb[0].mxu1 }
 0x14f   :  { %v540_v30 = vpop.f32.mrb[1].mxu0  ;;  %v316_v31 = vadd.f32 %v315_v28, %v220_v27  ;;  %v560_v32 = vpop.f32.mrb[1].mxu1 }
 0x150   :  { %v223_v33 = vpop.f32.mrb[2].mxu0  ;;  %v318_v34 = vpop.f32.mrb[2].mxu1 }
 0x151   :  { %v541_v35 = vpop.f32.mrb[3].mxu0  ;;  %v329_v36 = vadd.f32 %v485_v29, %v316_v31  ;;  %v319_v37 = vadd.f32 %v318_v34, %v223_v33  ;;  %v561_v38 = vpop.f32.mrb[3].mxu1 }
 0x153   :  { %v330_v39 = vadd.f32 %v485_v29, %v319_v37  ;;  %620 = vtanh.f32 %v329_v36 }
 0x155   :  { %622 = vtanh.f32 %v330_v39 }
 0x15d   :  { %v621_v40 = vpop.eup %620 }
 0x15f   :  { %v623_v41 = vpop.eup %622 }
 0x160   :  { %v333_v42 = vpack.c.bf16 %v623_v41, %v621_v40 }
 0x162   :  { %579 = vmatmul.mubr.bf16.vlgmr.msra.gmra.mrb[4].mxu0 %v333_v42 }
 0x235   :  { %v439_v44 = vpop.f32.mrb[4].mxu0 }
 0x236   :  { %v440_v45 = vadd.f32 %v486_v43, %v439_v44  ;;  %v580_v46 = vpop.f32.mrb[5].mxu0 }
 0x237   :  { %v442_v47 = vpop.f32.mrb[6].mxu0 }
 0x238   :  { %446 = vst [vmem:[#allocation11] sm:$0xff] %v440_v45  ;;  %v443_v48 = vadd.f32 %v486_v43, %v442_v47  ;;  %v581_v49 = vpop.f32.mrb[7].mxu0 }
 0x23a   :  { %447 = vst [vmem:[#allocation11 + $0x8] sm:$0xff] %v443_v48 }
 0x23b   :  { %745 = shalt.err (!%p742_p2)
}
 0x23c   :  { %s746_s19 = scalar_lea.hbm %s960_s7, 256 }
 0x23d   :  { %p747_p3 = scmp.ne.s32.totalorder %s960_s7, %s746_s19  ;;  %p750_p4 = scmp.lt.u32.totalorder %s746_s19, %s960_s7 }
 0x23f   :  { %p752_p5 = pnand %p750_p4, %p747_p3 }
 0x241   :  { %755 = shalt.err (!%p752_p5)
}
 0x242   :  { %s774_s24 = smov 128   ;;  %s775_s1 = smov 8  }
 0x243   :  { %459 = dma.vmem_to_hbm [thread:$0]  %s454_s27, 256, %s960_s7, [#allocation4], %s774_s24, %s774_s24, %s775_s1  }
 0x244   :  { %762 = dma.done.wait [#allocation4], 256  }
 0x245   :  { %763 = vsyncadd [#allocation4], 4294967040 }
 0x246   :  { %463 = vsyncpa [#allocation3], 1 }
 0x247   :  { %464 = vsyncpa [#allocation6], 1 }
 0x248   :  { %465 = vsyncpa [#allocation9], 1 }
 0x249   :  { %466 = vsyncpa [#allocation4], 1 }

</bundles_post_ra>
